<compile_context>
chip_gen: v7x
topology: tpu7x:2x2x1
jax: 0.10.0
libtpu: 0.0.40
codegen_flags: <defaults>
</compile_context>

<pallas_src>
import functools

import jax
import jax.numpy as jnp
from jax import lax
from jax.experimental import pallas as pl
from jax.experimental.pallas import tpu as pltpu


def _ce_focal_kernel(x_ref, t_ref, w_ref, loss_ref, *, gamma):
    """Per-row-tile focal loss: stable log-sum-exp, one-hot target gather,
    focal modulation. Emits per-row loss only (reduction happens outside)."""
    x = x_ref[...].astype(jnp.float32)        # (tn, C) logits (upcast in VMEM)
    tgt = t_ref[...]                          # (tn, 1) int32 class ids
    w = w_ref[...]                            # (tn, 1) f32 = weight[target]

    tn, C = x.shape
    classes = lax.broadcasted_iota(jnp.int32, (tn, C), 1)
    onehot = (classes == tgt).astype(jnp.float32)             # (tn, C)

    # stable log-sum-exp
    m = jnp.max(x, axis=-1, keepdims=True)                    # (tn, 1)
    sumexp = jnp.sum(jnp.exp(x - m), axis=-1, keepdims=True)  # (tn, 1)
    lse = m + jnp.log(sumexp)                                 # (tn, 1)

    # target logit via one-hot reduction
    tgt_logit = jnp.sum(x * onehot, axis=-1, keepdims=True)   # (tn, 1)

    # cross_entropy(..., reduction='none') with per-row (gathered) class weight
    ce = (lse - tgt_logit) * w                                # (tn, 1)
    # true class probability p_t = softmax(x)[target]
    true_prob = jnp.exp(tgt_logit - lse)                      # (tn, 1)
    one_minus = jnp.maximum(1.0 - true_prob, 0.0)             # clamp (NaN-safe)

    g = float(gamma)
    if g == int(g) and 0 <= int(g) <= 8:
        # integer gamma (default 2.0): repeated VALU multiplies, no EUP power
        focal = jnp.ones_like(one_minus)
        for _ in range(int(g)):
            focal = focal * one_minus
    else:
        focal = one_minus ** g

    loss_ref[...] = focal * ce


def _round_up(x, m):
    return (x + m - 1) // m * m


def _pick_row_tile(n_rows, n_classes, itemsize):
    """Pick a row tile so the logits block is ~4 MiB (clamped to [8, 1024])."""
    target_block_bytes = 4 * 1024 * 1024
    tn = target_block_bytes // max(1, n_classes * itemsize)
    tn = max(8, min(int(tn), 1024))
    tn = min(tn, _round_up(n_rows, 8))    # don't over-pad tiny batches
    tn = max(8, (tn // 8) * 8)
    return tn


def ce_focal_loss_pallas(logits, target, weight=None, gamma=2.0,
                         reduction="elementwise_mean", tn=None):
    """Pallas implementation of ce_focal_loss for (N, C) logits, (N,) targets."""
    logits = jnp.asarray(logits)
    N, C = logits.shape
    dtype = logits.dtype

    if tn is None:
        tn = _pick_row_tile(N, C, dtype.itemsize)
    else:
        tn = max(8, (int(tn) // 8) * 8)

    Np = _round_up(N, tn)
    pad = Np - N

    tgt = jnp.asarray(target).astype(jnp.int32)
    if weight is None:
        w_row = jnp.ones((N,), jnp.float32)
    else:
        w_row = jnp.asarray(weight, jnp.float32)[tgt]   # gather once in wrapper

    x = logits                                          # keep native dtype
    if pad:
        x = jnp.pad(x, ((0, pad), (0, 0)))
        tgt = jnp.pad(tgt, (0, pad))
        w_row = jnp.pad(w_row, (0, pad))                # zero weight => zero loss

    t2 = tgt.reshape(Np, 1)
    w2 = w_row.reshape(Np, 1)

    # double-buffered working set: logits block + targets + weights + loss out
    block_bytes = tn * C * dtype.itemsize + tn * 4 * 3
    vmem_limit = int(min(max(2 * block_bytes + (4 << 20), 16 << 20), 64 << 20))

    loss = pl.pallas_call(
        functools.partial(_ce_focal_kernel, gamma=gamma),
        out_shape=jax.ShapeDtypeStruct((Np, 1), jnp.float32),
        grid_spec=pltpu.PrefetchScalarGridSpec(
            num_scalar_prefetch=0,
            grid=(Np // tn,),
            in_specs=[
                pl.BlockSpec((tn, C), lambda i: (i, 0)),   # logits tile (native dtype)
                pl.BlockSpec((tn, 1), lambda i: (i, 0)),   # targets tile
                pl.BlockSpec((tn, 1), lambda i: (i, 0)),   # gathered weight tile
            ],
            out_specs=pl.BlockSpec((tn, 1), lambda i: (i, 0)),
        ),
        compiler_params=pltpu.CompilerParams(
            dimension_semantics=("parallel",),             # no in-kernel reduction
            vmem_limit_bytes=vmem_limit,
        ),
    )(x, t2, w2)

    if reduction == "none":
        return loss[:N, 0]
    elif reduction == "sum":
        return jnp.sum(loss)                # padded rows contribute exactly 0
    elif reduction == "elementwise_mean":
        return jnp.sum(loss) / jnp.float32(N)
    else:
        raise ValueError('bad reduction value. Valid values are: "none", "sum" or "elementwise_mean"')


def _reference(logits, target, weight, gamma, reduction):
    """Pure-JAX reference mirroring torch semantics (verification only)."""
    logits = jnp.asarray(logits, jnp.float32)
    logp = jax.nn.log_softmax(logits, axis=1)
    tgt_logp = jnp.take_along_axis(logp, target[:, None], axis=1)[:, 0]
    w = jnp.ones((logits.shape[1],), jnp.float32) if weight is None else jnp.asarray(weight, jnp.float32)
    ce = -tgt_logp * w[target]
    p_t = jnp.exp(tgt_logp)
    loss = (1.0 - p_t) ** gamma * ce
    if reduction == "none":
        return loss
    if reduction == "sum":
        return loss.sum()
    return loss.mean()


class CEFocalLoss:
    """JAX/Pallas stand-in for the PyTorch CEFocalLoss module."""

    def __init__(self, weight=None, gamma=2.0, reduction="elementwise_mean"):
        self.weight = weight
        self.gamma = gamma
        self.reduction = reduction

    def __call__(self, input, target):
        return ce_focal_loss_pallas(input, target, weight=self.weight,
                                    gamma=self.gamma, reduction=self.reduction)


if __name__ == "__main__":
    key = jax.random.PRNGKey(0)

    # --- case 1: small (N, C) with per-class weights, mean reduction ---
    N, C = 16, 32
    k1, k2, key = jax.random.split(key, 3)
    logits = jax.random.normal(k1, (N, C), dtype=jnp.float32)
    target = jax.random.randint(k2, (N,), 0, C, dtype=jnp.int32)
    weight = jnp.linspace(0.5, 1.5, C, dtype=jnp.float32)

    module = CEFocalLoss(weight=weight, gamma=2.0, reduction="elementwise_mean")
    out = jax.block_until_ready(module(logits, target))
    ref = _reference(logits, target, weight, 2.0, "elementwise_mean")
    assert jnp.allclose(out, ref, rtol=1e-5, atol=1e-5), (out, ref)

    out_none = jax.block_until_ready(
        ce_focal_loss_pallas(logits, target, weight=weight, gamma=2.0, reduction="none"))
    ref_none = _reference(logits, target, weight, 2.0, "none")
    assert jnp.allclose(out_none, ref_none, rtol=1e-5, atol=1e-5)

    # --- case 2: ragged batch (N not a multiple of 8), no weights, sum ---
    N2, C2 = 13, 40
    k3, k4, key = jax.random.split(key, 3)
    logits2 = jax.random.normal(k3, (N2, C2), dtype=jnp.float32)
    target2 = jax.random.randint(k4, (N2,), 0, C2, dtype=jnp.int32)
    out2 = jax.block_until_ready(
        ce_focal_loss_pallas(logits2, target2, weight=None, gamma=2.0, reduction="sum"))
    ref2 = _reference(logits2, target2, None, 2.0, "sum")
    assert jnp.allclose(out2, ref2, rtol=1e-5, atol=1e-5), (out2, ref2)

    # --- case 3: native bf16 logits (no wrapper upcast), non-integer gamma ---
    N3, C3 = 24, 128
    k5, k6, key = jax.random.split(key, 3)
    logits3 = jax.random.normal(k5, (N3, C3), dtype=jnp.bfloat16)
    target3 = jax.random.randint(k6, (N3,), 0, C3, dtype=jnp.int32)
    out3 = jax.block_until_ready(
        ce_focal_loss_pallas(logits3, target3, weight=None, gamma=1.5,
                             reduction="elementwise_mean"))
    ref3 = _reference(logits3, target3, None, 1.5, "elementwise_mean")
    assert jnp.allclose(out3, ref3, rtol=2e-2, atol=2e-2), (out3, ref3)

    print("KERNEL_OK")
</pallas_src>

<mosaic_0001>
module attributes {stable_mosaic.version = 11 : i64} {
  func.func @_ce_focal_kernel(%arg0: i32, %arg1: memref<16x32xf32, #tpu.memory_space<vmem>>, %arg2: memref<16x1xi32, #tpu.memory_space<vmem>>, %arg3: memref<16x1xf32, #tpu.memory_space<vmem>>, %arg4: memref<16x1xf32, #tpu.memory_space<vmem>>) attributes {dimension_semantics = [#tpu.dimension_semantics<parallel>], iteration_bounds = array<i64: 1>, scalar_prefetch = 0 : i64, scratch_operands = 0 : i64, tpu.core_type = #tpu.core_type<tc>, window_params = [{transform_indices = @transform_0, window_bounds = array<i64: 16, 32>}, {transform_indices = @transform_1, window_bounds = array<i64: 16, 1>}, {transform_indices = @transform_2, window_bounds = array<i64: 16, 1>}, {transform_indices = @transform_3, window_bounds = array<i64: 16, 1>}]} {
    %c0 = arith.constant 0 : index
    %c0_0 = arith.constant 0 : index
    %0 = vector.load %arg1[%c0, %c0_0] : memref<16x32xf32, #tpu.memory_space<vmem>>, vector<16x32xf32>
    %c0_1 = arith.constant 0 : index
    %c0_2 = arith.constant 0 : index
    %1 = vector.load %arg2[%c0_1, %c0_2] : memref<16x1xi32, #tpu.memory_space<vmem>>, vector<16x1xi32>
    %c0_3 = arith.constant 0 : index
    %c0_4 = arith.constant 0 : index
    %2 = vector.load %arg3[%c0_3, %c0_4] : memref<16x1xf32, #tpu.memory_space<vmem>>, vector<16x1xf32>
    %3 = tpu.iota {dimensions = array<i32: 1>} : vector<16x32xi32>
    %4 = vector.broadcast %1 : vector<16x1xi32> to vector<16x32xi32>
    %5 = arith.cmpi eq, %3, %4 : vector<16x32xi32>
    %6 = arith.extui %5 : vector<16x32xi1> to vector<16x32xi32>
    %7 = arith.sitofp %6 : vector<16x32xi32> to vector<16x32xf32>
    %cst = arith.constant dense<0xFF800000> : vector<16xf32>
    %8 = vector.multi_reduction <maximumf>, %0, %cst [1] : vector<16x32xf32> to vector<16xf32>
    %9 = vector.shape_cast %8 : vector<16xf32> to vector<16x1xf32>
    %10 = vector.broadcast %9 : vector<16x1xf32> to vector<16x32xf32>
    %11 = arith.subf %0, %10 : vector<16x32xf32>
    %12 = math.exp %11 : vector<16x32xf32>
    %cst_5 = arith.constant dense<0.000000e+00> : vector<16xf32>
    %13 = vector.multi_reduction <add>, %12, %cst_5 [1] : vector<16x32xf32> to vector<16xf32>
    %14 = vector.shape_cast %13 : vector<16xf32> to vector<16x1xf32>
    %15 = math.log %14 : vector<16x1xf32>
    %16 = arith.addf %9, %15 : vector<16x1xf32>
    %17 = arith.mulf %0, %7 : vector<16x32xf32>
    %cst_6 = arith.constant dense<0.000000e+00> : vector<16xf32>
    %18 = vector.multi_reduction <add>, %17, %cst_6 [1] : vector<16x32xf32> to vector<16xf32>
    %19 = vector.shape_cast %18 : vector<16xf32> to vector<16x1xf32>
    %20 = arith.subf %16, %19 : vector<16x1xf32>
    %21 = arith.mulf %20, %2 : vector<16x1xf32>
    %22 = arith.subf %19, %16 : vector<16x1xf32>
    %23 = math.exp %22 : vector<16x1xf32>
    %cst_7 = arith.constant 1.000000e+00 : f32
    %24 = vector.broadcast %cst_7 : f32 to vector<16x1xf32>
    %25 = arith.subf %24, %23 : vector<16x1xf32>
    %cst_8 = arith.constant 0.000000e+00 : f32
    %26 = vector.broadcast %cst_8 : f32 to vector<16x1xf32>
    %27 = arith.maximumf %25, %26 : vector<16x1xf32>
    %cst_9 = arith.constant 1.000000e+00 : f32
    %28 = vector.broadcast %cst_9 : f32 to vector<16x1xf32>
    %29 = arith.mulf %28, %27 : vector<16x1xf32>
    %30 = arith.mulf %29, %27 : vector<16x1xf32>
    %31 = arith.mulf %30, %21 : vector<16x1xf32>
    %c0_10 = arith.constant 0 : index
    %c0_11 = arith.constant 0 : index
    %32 = vector.load %arg4[%c0_10, %c0_11] : memref<16x1xf32, #tpu.memory_space<vmem>>, vector<16x1xf32>
    tpu.vector_store %arg4[%c0_10, %c0_11], %31 {strides = array<i32>} : memref<16x1xf32, #tpu.memory_space<vmem>>, vector<16x1xf32>,
    return
  }
  func.func @transform_0(%arg0: i32) -> (i32, i32) {
    %c0_i32 = arith.constant 0 : i32
    %c0_i32_0 = arith.constant 0 : i32
    return %arg0, %c0_i32 : i32, i32
  }
  func.func @transform_1(%arg0: i32) -> (i32, i32) {
    %c0_i32 = arith.constant 0 : i32
    %c0_i32_0 = arith.constant 0 : i32
    return %arg0, %c0_i32 : i32, i32
  }
  func.func @transform_2(%arg0: i32) -> (i32, i32) {
    %c0_i32 = arith.constant 0 : i32
    %c0_i32_0 = arith.constant 0 : i32
    return %arg0, %c0_i32 : i32, i32
  }
  func.func @transform_3(%arg0: i32) -> (i32, i32) {
    %c0_i32 = arith.constant 0 : i32
    %c0_i32_0 = arith.constant 0 : i32
    return %arg0, %c0_i32 : i32, i32
  }
}

</mosaic_0001>

<bundles_post_ra>
// kernel: tpu_custom_call.1
= control target key start
LH: loop header
LB: loop body
LE: loop exit
PB: predicated region body
PF: predicated region fallthrough
CT: control target
= control target key end

     0   :  { %vm34_vm0 = vcmask 261120   ;;  %v110_v2 = vmov 0   ;;  %v20_v8 = vlaneseq  ;;  %v111_v17 = vmov 0.0   ;;  %s162_s0 = inlined_call_operand.vmem [shape: f32[16,32], index: 0, kind: input, shape index: {}]   ;;  %s163_s1 = inlined_call_operand.vmem [shape: s32[16,1], index: 1, kind: input, shape index: {}]   ;;  %s164_s2 = inlined_call_operand.vmem [shape: f32[16,1], index: 2, kind: input, shape index: {}]   ;;  %s165_s3 = inlined_call_operand.vmem [shape: f32[16,1], index: 3, kind: output, shape index: {}]  }
   0x1   :  { %v14_v0 = vld [vmem:[%s162_s0] sm:$0xff]  ;;  %v15_v1 = vld [vmem:[%s162_s0 + $0x8] sm:$0xff]  ;;  %96 = vset.pattern.permute.xlu1 %v110_v2  ;;  %97 = vset.pattern.permute.xlu0 %v110_v2  ;;  %vm85_vm3 = vcmask 7168  }
   0x2   :  { %v16_v3 = vld [vmem:[%s163_s1] sm:$0xff]  ;;  %v35_v4 = vsel %vm34_vm0, %v14_v0, -inf  ;;  %v17_v5 = vld [vmem:[%s163_s1 + $0x8] sm:$0xff]  ;;  %v38_v6 = vsel %vm34_vm0, %v15_v1, -inf  ;;  %v21_v13 = vand.u32 127, %v20_v8 }
   0x3   :  { %23 = vperm.xlu1 %96, %v16_v3   ;;  %36 = vmax.xlane.f32.xlu0 %v35_v4  ;;  %v18_v45 = vld [vmem:[%s164_s2] sm:$0xff]  ;;  %v19_v52 = vld [vmem:[%s164_s2 + $0x8] sm:$0xff] }
   0x7   :  { %26 = vperm.xlu1 %96, %v17_v5   ;;  %39 = vmax.xlane.f32.xlu0 %v38_v6 }
  0x82   :  { %v24_v11 = vpop.permute.xlu1 %23 }
  0x83   :  { %vm28_vm1 = vcmp.eq.s32.totalorder %v21_v13, %v24_v11 }
  0x84   :  { %v92_v18 = vsel %vm28_vm1, 1.0, %v111_v17 }
  0x85   :  { %v59_v19 = vmul.f32 %v92_v18, %v14_v0 }
  0x86   :  { %v27_v16 = vpop.permute.xlu1 %26 }
  0x87   :  { %vm29_vm2 = vcmp.eq.s32.totalorder %v21_v13, %v27_v16  ;;  %v61_v23 = vsel %vm34_vm0, %v59_v19, 0.0 }
  0x88   :  { %v93_v21 = vsel %vm29_vm2, 1.0, %v111_v17 }
  0x89   :  { %v60_v24 = vmul.f32 %v93_v21, %v15_v1 }
  0x8b   :  { %v64_v27 = vsel %vm34_vm0, %v60_v24, 0.0 }
  0x90   :  { %v37_v7 = vpop.xlane.xlu0 %36 }
  0x91   :  { %v41_v9 = vsub.f32 %v14_v0, %v37_v7 }
  0x93   :  { %v43_v10 = vmul.f32 1.442695, %v41_v9 }
  0x94   :  { %v40_v12 = vpop.xlane.xlu0 %39 }
  0x95   :  { %98 = vpow2.f32 %v43_v10  ;;  %v42_v14 = vsub.f32 %v15_v1, %v40_v12 }
  0x97   :  { %v45_v15 = vmul.f32 1.442695, %v42_v14 }
  0x99   :  { %100 = vpow2.f32 %v45_v15 }
  0x9f   :  { %v99_v20 = vpop.eup %98 }
  0xa0   :  { %v47_v22 = vsel %vm34_vm0, %v99_v20, 0.0 }
  0xa1   :  { %48 = vadd.xlane.f32.xlu0 %v47_v22 }
  0xa3   :  { %v101_v25 = vpop.eup %100 }
  0xa4   :  { %v50_v26 = vsel %vm34_vm0, %v101_v25, 0.0 }
  0xa5   :  { %51 = vadd.xlane.f32.xlu1 %v50_v26  ;;  %62 = vadd.xlane.f32.xlu0 %v61_v23 }
  0xa9   :  { %65 = vadd.xlane.f32.xlu0 %v64_v27 }
 0x12e   :  { %v49_v28 = vpop.xlane.xlu0 %48 }
 0x12f   :  { %102 = vlog2.f32 %v49_v28 }
 0x132   :  { %v52_v29 = vpop.xlane.xlu1 %51  ;;  %v63_v32 = vpop.xlane.xlu0 %62 }
 0x133   :  { %104 = vlog2.f32 %v52_v29 }
 0x136   :  { %v66_v39 = vpop.xlane.xlu0 %65 }
 0x139   :  { %v103_v30 = vpop.eup %102 }
 0x13a   :  { %v54_v31 = vmul.f32 0.6931472, %v103_v30 }
 0x13c   :  { %v57_v33 = vadd.f32 %v54_v31, %v37_v7 }
 0x13d   :  { %v105_v34 = vpop.eup %104 }
 0x13e   :  { %v56_v35 = vmul.f32 0.6931472, %v105_v34  ;;  %v71_v36 = vsub.f32 %v63_v32, %v57_v33  ;;  %v67_v43 = vsub.f32 %v57_v33, %v63_v32 }
 0x140   :  { %v73_v37 = vmul.f32 1.442695, %v71_v36  ;;  %v58_v38 = vadd.f32 %v56_v35, %v40_v12  ;;  %v69_v48 = vmul.f32 %v67_v43, %v18_v45 }
 0x142   :  { %106 = vpow2.f32 %v73_v37  ;;  %v72_v40 = vsub.f32 %v66_v39, %v58_v38  ;;  %v68_v50 = vsub.f32 %v58_v38, %v66_v39 }
 0x144   :  { %v75_v41 = vmul.f32 1.442695, %v72_v40  ;;  %v70_v55 = vmul.f32 %v68_v50, %v19_v52 }
 0x146   :  { %108 = vpow2.f32 %v75_v41 }
 0x14c   :  { %v107_v42 = vpop.eup %106 }
 0x14d   :  { %v77_v44 = vsub.f32 1.0, %v107_v42 }
 0x14f   :  { %v79_v46 = vmax.f32 %v77_v44, 0.0 }
 0x150   :  { %v109_v47 = vpop.eup %108 }
 0x151   :  { %v81_v49 = vmul.f32 %v79_v46, %v79_v46  ;;  %v78_v51 = vsub.f32 1.0, %v109_v47 }
 0x153   :  { %v83_v53 = vmul.f32 %v81_v49, %v69_v48  ;;  %v80_v54 = vmax.f32 %v78_v51, 0.0 }
 0x155   :  { %86 = vst.msk [vmem:[%s165_s3] sm:$0xff] %vm85_vm3, %v83_v53  ;;  %v82_v56 = vmul.f32 %v80_v54, %v80_v54 }
 0x157   :  { %v84_v57 = vmul.f32 %v82_v56, %v70_v55 }
 0x159   :  { %87 = vst.msk [vmem:[%s165_s3 + $0x8] sm:$0xff] %vm85_vm3, %v84_v57 }

</bundles_post_ra>
